<compile_context>
chip_gen: v6e
topology: v6e:2x2x1
jax: 0.10.0
libtpu: 0.0.40
codegen_flags: <defaults>
</compile_context>

<pallas_src>
import functools

import jax
import jax.numpy as jnp
from jax import lax
from jax.experimental import pallas as pl
from jax.experimental.pallas import tpu as pltpu

# Module constants from the GPT script.
N_EMBD = 384
BLOCK_SIZE = 256                 # causal-mask capacity (T <= BLOCK_SIZE)
HEAD_SIZE = 64                   # n_embd // n_head in the GPT script


def _bf16_exp_ok():
    """bf16 EUP (transcendentals) exists on TPU v6e and newer; not on <= v5."""
    try:
        kind = jax.devices()[0].device_kind.lower()
    except Exception:
        return False
    if "tpu" not in kind:
        return False
    for old in ("v2", "v3", "v4", "v5"):
        if old in kind:
            return False
    return True


def _pick_bt(batch, max_bt=8):
    """Largest divisor of `batch` that is <= max_bt (keeps per-step VMEM modest)."""
    for cand in range(min(batch, max_bt), 0, -1):
        if batch % cand == 0:
            return cand
    return 1


# ----------------------------------------------------------------------------
# Kernel: Bt batch elements of causal single-head attention per grid step.
# ----------------------------------------------------------------------------
def _head_kernel(x_ref, wqkv_ref, o_ref, *, head_size, exp_dtype):
    _, bt, t, c = x_ref.shape
    hs = head_size

    x = x_ref[0]                                   # (Bt, T, C)   bf16
    wqkv = wqkv_ref[...]                           # (C, 3*hs)    bf16

    # Fused QKV projection for all Bt*T rows at once (M = Bt*T, N = 3*hs).
    qkv = jnp.dot(x.reshape(bt * t, c), wqkv,
                  preferred_element_type=jnp.float32)          # (Bt*T, 3hs) f32
    qkv = qkv.reshape(bt, t, 3 * hs)

    # Scale q (T*hs multiplies) instead of the (T,T) score matrix.
    q = qkv[:, :, 0 * hs:1 * hs] * (hs ** -0.5)
    k = qkv[:, :, 1 * hs:2 * hs]
    v = qkv[:, :, 2 * hs:3 * hs]

    # Batched q . k^T contracting the last dims directly (no materialized transpose).
    s = jnp.einsum('bqd,bkd->bqk',
                   q.astype(jnp.bfloat16), k.astype(jnp.bfloat16),
                   preferred_element_type=jnp.float32)          # (Bt, T, T) f32

    # Causal (tril) mask as a finite large-negative fill; diagonal always unmasked.
    row = lax.broadcasted_iota(jnp.int32, (bt, t, t), 1)
    col = lax.broadcasted_iota(jnp.int32, (bt, t, t), 2)
    s = jnp.where(col <= row, s, -1e30)

    # Softmax: max-subtract in f32, exp in bf16 on v6e/v7x (f32 on v5e).
    s = s - jnp.max(s, axis=-1, keepdims=True)
    p = jnp.exp(s.astype(exp_dtype))
    denom = jnp.sum(p.astype(jnp.float32), axis=-1, keepdims=True)
    inv = pl.reciprocal(denom, approx=True)                     # EUP slot (free-ish)

    # TODO(synk): dropout(p) in training mode not implemented (identity in eval).

    out = jnp.einsum('bqk,bkd->bqd',
                     p.astype(jnp.bfloat16), v.astype(jnp.bfloat16),
                     preferred_element_type=jnp.float32)        # (Bt, T, hs) f32
    out = out * inv                                             # normalize after p@v

    # Lane-dense store: pack the Bt head outputs along lanes -> (T, Bt*hs) >= 128.
    out2d = jnp.concatenate([out[b] for b in range(bt)], axis=-1)
    o_ref[0] = out2d.astype(o_ref.dtype)


# ----------------------------------------------------------------------------
# Wrapper matching Head.forward
# ----------------------------------------------------------------------------
def head_attention(x, wqkv, *, head_size=HEAD_SIZE):
    """x: (B, T, C) float; wqkv: (C, 3*head_size) = [Wq | Wk | Wv] (pre-transposed).

    Returns (B, T, head_size) in bfloat16 (matmuls run in bf16 on the MXU).
    """
    B, T, C = x.shape
    assert T <= BLOCK_SIZE, "sequence length exceeds causal-mask capacity"
    hs = head_size

    bt = _pick_bt(B)                 # batch elements per grid step
    nb = B // bt

    # bf16 operands for the MXU; group Bt batch elements per grid step.
    xb = x.astype(jnp.bfloat16).reshape(nb, bt, T, C)
    wb = wqkv.astype(jnp.bfloat16)

    flops = B * (2 * T * C * 3 * hs     # fused QKV projection
                 + 2 * T * T * hs       # q @ k^T
                 + 2 * T * T * hs)      # p @ v
    bytes_accessed = (xb.size * 2) + (wb.size * 2) + (B * T * hs * 2)
    cost = pl.CostEstimate(flops=flops, transcendentals=B * T * T,
                           bytes_accessed=bytes_accessed)

    exp_dtype = jnp.bfloat16 if _bf16_exp_ok() else jnp.float32
    kernel = functools.partial(_head_kernel, head_size=hs, exp_dtype=exp_dtype)

    y = pl.pallas_call(
        kernel,
        out_shape=jax.ShapeDtypeStruct((nb, T, bt * hs), jnp.bfloat16),
        grid_spec=pltpu.PrefetchScalarGridSpec(
            num_scalar_prefetch=0,
            grid=(nb,),
            in_specs=[
                pl.BlockSpec((1, bt, T, C), lambda i: (i, 0, 0, 0)),   # Bt activations
                pl.BlockSpec((C, 3 * hs), lambda i: (0, 0)),           # fused weight, resident
            ],
            out_specs=pl.BlockSpec((1, T, bt * hs), lambda i: (i, 0, 0)),
        ),
        compiler_params=pltpu.CompilerParams(
            dimension_semantics=("parallel",),   # shard batch-groups across TCs (v7x)
        ),
        cost_estimate=cost,
    )(xb, wb)

    # Un-pack the lane-dense (T, Bt*hs) slabs back to (B, T, hs).
    y = y.reshape(nb, T, bt, hs).transpose(0, 2, 1, 3).reshape(B, T, hs)
    return y


def init_params(key, n_embd=N_EMBD, head_size=HEAD_SIZE):
    """Per-head Linear weights, stored as (C, hs) == Linear.weight.T, fused to (C, 3*hs)."""
    kq, kk, kv = jax.random.split(key, 3)
    scale = 0.02
    wq = scale * jax.random.normal(kq, (n_embd, head_size), jnp.float32)
    wk = scale * jax.random.normal(kk, (n_embd, head_size), jnp.float32)
    wv = scale * jax.random.normal(kv, (n_embd, head_size), jnp.float32)
    # Fused layout [Wq | Wk | Wv]; stored bf16 (MXU-native, halves weight traffic).
    return {"wqkv": jnp.concatenate([wq, wk, wv], axis=1).astype(jnp.bfloat16)}


if __name__ == "__main__":
    key = jax.random.PRNGKey(0)
    k_x, k_p = jax.random.split(key)

    B, T = 2, 8                     # small demo shapes, T <= block_size (256)
    x = jax.random.normal(k_x, (B, T, N_EMBD), jnp.float32)
    params = init_params(k_p)

    y = head_attention(x, params["wqkv"])
    jax.block_until_ready(y)
    assert y.shape == (B, T, HEAD_SIZE)
    print("KERNEL_OK")
</pallas_src>

<mosaic_0001>
module attributes {stable_mosaic.version = 11 : i64} {
  func.func @_head_kernel(%arg0: i32, %arg1: memref<1x2x8x384xbf16, #tpu.memory_space<vmem>>, %arg2: memref<384x192xbf16, #tpu.memory_space<vmem>>, %arg3: memref<1x8x128xbf16, #tpu.memory_space<vmem>>) attributes {dimension_semantics = [#tpu.dimension_semantics<parallel>], iteration_bounds = array<i64: 1>, scalar_prefetch = 0 : i64, scratch_operands = 0 : i64, tpu.core_type = #tpu.core_type<tc>, window_params = [{transform_indices = @transform_0, window_bounds = array<i64: 1, 2, 8, 384>}, {pipeline_mode = #tpu.pipeline_mode<synchronous>, transform_indices = @transform_1, window_bounds = array<i64: 384, 192>}, {transform_indices = @transform_2, window_bounds = array<i64: 1, 8, 128>}]} {
    %c0 = arith.constant 0 : index
    %c0_0 = arith.constant 0 : index
    %c0_1 = arith.constant 0 : index
    %c0_2 = arith.constant 0 : index
    %0 = vector.load %arg1[%c0, %c0_0, %c0_1, %c0_2] : memref<1x2x8x384xbf16, #tpu.memory_space<vmem>>, vector<1x2x8x384xbf16>
    %1 = vector.shape_cast %0 : vector<1x2x8x384xbf16> to vector<2x8x384xbf16>
    %c0_3 = arith.constant 0 : index
    %c0_4 = arith.constant 0 : index
    %2 = vector.load %arg2[%c0_3, %c0_4] : memref<384x192xbf16, #tpu.memory_space<vmem>>, vector<384x192xbf16>
    %3 = vector.shape_cast %1 : vector<2x8x384xbf16> to vector<16x384xbf16>
    %cst = arith.constant dense<0.000000e+00> : vector<16x192xf32>
    %4 = tpu.matmul %3, %2, %cst {dimension_numbers = #tpu.dot_dimension_numbers<[1], [0], [0], [1], [0, 0, 1, 1], [], []>} : vector<16x384xbf16>, vector<384x192xbf16>, vector<16x192xf32> -> vector<16x192xf32>
    %5 = vector.shape_cast %4 : vector<16x192xf32> to vector<2x8x192xf32>
    %6 = vector.extract_strided_slice %5 {offsets = [0, 0, 0], sizes = [2, 8, 64], strides = [1, 1, 1]} : vector<2x8x192xf32> to vector<2x8x64xf32>
    %cst_5 = arith.constant 1.250000e-01 : f32
    %7 = vector.broadcast %cst_5 : f32 to vector<2x8x64xf32>
    %8 = arith.mulf %6, %7 : vector<2x8x64xf32>
    %9 = vector.extract_strided_slice %5 {offsets = [0, 0, 64], sizes = [2, 8, 64], strides = [1, 1, 1]} : vector<2x8x192xf32> to vector<2x8x64xf32>
    %10 = vector.extract_strided_slice %5 {offsets = [0, 0, 128], sizes = [2, 8, 64], strides = [1, 1, 1]} : vector<2x8x192xf32> to vector<2x8x64xf32>
    %11 = arith.truncf %8 : vector<2x8x64xf32> to vector<2x8x64xbf16>
    %12 = arith.truncf %9 : vector<2x8x64xf32> to vector<2x8x64xbf16>
    "tpu.trace_start"() <{level = 10 : i32, message = "bqd,bkd->bqk"}> : () -> ()
    %cst_6 = arith.constant dense<0.000000e+00> : vector<2x8x8xf32>
    %13 = tpu.matmul %11, %12, %cst_6 {dimension_numbers = #tpu.dot_dimension_numbers<[2], [2], [1], [1], [0, 0, 0, 1, 1, 1], [0], [0]>} : vector<2x8x64xbf16>, vector<2x8x64xbf16>, vector<2x8x8xf32> -> vector<2x8x8xf32>
    "tpu.trace_stop"() : () -> ()
    %14 = tpu.iota {dimensions = array<i32: 1>} : vector<2x8x8xi32>
    %15 = tpu.iota {dimensions = array<i32: 2>} : vector<2x8x8xi32>
    %16 = arith.cmpi sle, %15, %14 : vector<2x8x8xi32>
    %cst_7 = arith.constant -1.000000e+30 : f32
    %17 = vector.broadcast %cst_7 : f32 to vector<2x8x8xf32>
    %18 = arith.select %16, %13, %17 : vector<2x8x8xi1>, vector<2x8x8xf32>
    %cst_8 = arith.constant dense<0xFF800000> : vector<2x8xf32>
    %19 = vector.multi_reduction <maximumf>, %18, %cst_8 [2] : vector<2x8x8xf32> to vector<2x8xf32>
    %20 = vector.shape_cast %19 : vector<2x8xf32> to vector<2x8x1xf32>
    %21 = vector.broadcast %20 : vector<2x8x1xf32> to vector<2x8x8xf32>
    %22 = arith.subf %18, %21 : vector<2x8x8xf32>
    %23 = math.exp %22 : vector<2x8x8xf32>
    %cst_9 = arith.constant dense<0.000000e+00> : vector<2x8xf32>
    %24 = vector.multi_reduction <add>, %23, %cst_9 [2] : vector<2x8x8xf32> to vector<2x8xf32>
    %25 = vector.shape_cast %24 : vector<2x8xf32> to vector<2x8x1xf32>
    %26 = tpu.reciprocal %25 {approx = true} : vector<2x8x1xf32> -> vector<2x8x1xf32>
    %27 = arith.truncf %23 : vector<2x8x8xf32> to vector<2x8x8xbf16>
    %28 = arith.truncf %10 : vector<2x8x64xf32> to vector<2x8x64xbf16>
    "tpu.trace_start"() <{level = 10 : i32, message = "bqk,bkd->bqd"}> : () -> ()
    %cst_10 = arith.constant dense<0.000000e+00> : vector<2x8x64xf32>
    %29 = tpu.matmul %27, %28, %cst_10 {dimension_numbers = #tpu.dot_dimension_numbers<[2], [1], [1], [2], [0, 0, 0, 1, 1, 2], [0], [0]>} : vector<2x8x8xbf16>, vector<2x8x64xbf16>, vector<2x8x64xf32> -> vector<2x8x64xf32>
    "tpu.trace_stop"() : () -> ()
    %30 = vector.broadcast %26 : vector<2x8x1xf32> to vector<2x8x64xf32>
    %31 = arith.mulf %29, %30 : vector<2x8x64xf32>
    %32 = vector.extract_strided_slice %31 {offsets = [0, 0, 0], sizes = [1, 8, 64], strides = [1, 1, 1]} : vector<2x8x64xf32> to vector<1x8x64xf32>
    %33 = vector.shape_cast %32 : vector<1x8x64xf32> to vector<8x64xf32>
    %34 = vector.extract_strided_slice %31 {offsets = [1, 0, 0], sizes = [1, 8, 64], strides = [1, 1, 1]} : vector<2x8x64xf32> to vector<1x8x64xf32>
    %35 = vector.shape_cast %34 : vector<1x8x64xf32> to vector<8x64xf32>
    %36 = tpu.concatenate %33, %35 in 1 : vector<8x64xf32>, vector<8x64xf32> -> vector<8x128xf32>
    %37 = arith.truncf %36 : vector<8x128xf32> to vector<8x128xbf16>
    %c0_11 = arith.constant 0 : index
    %c0_12 = arith.constant 0 : index
    %c0_13 = arith.constant 0 : index
    %38 = vector.load %arg3[%c0_11, %c0_12, %c0_13] : memref<1x8x128xbf16, #tpu.memory_space<vmem>>, vector<1x8x128xbf16>
    %39 = vector.shape_cast %38 : vector<1x8x128xbf16> to vector<8x128xbf16>
    %40 = vector.shape_cast %37 : vector<8x128xbf16> to vector<1x8x128xbf16>
    tpu.vector_store %arg3[%c0_11, %c0_12, %c0_13], %40 {strides = array<i32>} : memref<1x8x128xbf16, #tpu.memory_space<vmem>>, vector<1x8x128xbf16>,
    return
  }
  func.func @transform_0(%arg0: i32) -> (i32, i32, i32, i32) {
    %c0_i32 = arith.constant 0 : i32
    %c0_i32_0 = arith.constant 0 : i32
    %c0_i32_1 = arith.constant 0 : i32
    %c0_i32_2 = arith.constant 0 : i32
    return %arg0, %c0_i32, %c0_i32_0, %c0_i32_1 : i32, i32, i32, i32
  }
  func.func @transform_1(%arg0: i32) -> (i32, i32) {
    %c0_i32 = arith.constant 0 : i32
    %c0_i32_0 = arith.constant 0 : i32
    %c0_i32_1 = arith.constant 0 : i32
    return %c0_i32, %c0_i32_0 : i32, i32
  }
  func.func @transform_2(%arg0: i32) -> (i32, i32, i32) {
    %c0_i32 = arith.constant 0 : i32
    %c0_i32_0 = arith.constant 0 : i32
    %c0_i32_1 = arith.constant 0 : i32
    return %arg0, %c0_i32, %c0_i32_0 : i32, i32, i32
  }
}

</mosaic_0001>

<bundles_post_ra>
// kernel: tpu_custom_call.1
= control target key start
LH: loop header
LB: loop body
LE: loop exit
PB: predicated region body
PF: predicated region fallthrough
CT: control target
= control target key end

     0   :  { %v858_v2 = vmov 0   ;;  %s1062_s0 = inlined_call_operand.vmem [shape: bf16[1,2,8,384], index: 0, kind: input, shape index: {}]   ;;  %s1063_s1 = inlined_call_operand.vmem [shape: bf16[384,192], index: 1, kind: input, shape index: {}]   ;;  %s1064_s2 = inlined_call_operand.hbm [shape: bf16[1,8,128], index: 2, kind: output, shape index: {}]  }
   0x1   :  { %v752_v0 = vld [vmem:[%s1063_s1 + $0x74] ss:$8 sps:$4 sm:$0xff]   ;;  %v754_v1 = vld [vmem:[%s1063_s1 + $0x70] ss:$8 sps:$4 sm:$0xff]   ;;  %396 = vmatprep.mubr.bf16.mxu1 %v858_v2  ;;  %v755_v3 = vld [vmem:[%s1063_s1 + $0x64] ss:$8 sps:$4 sm:$0xff]  }
   0x2   :  { %321 = vmatprep.subr.bf16.mxu0 %v752_v0  ;;  %v757_v4 = vld [vmem:[%s1063_s1 + $0x60] ss:$8 sps:$4 sm:$0xff]   ;;  %v758_v5 = vld [vmem:[%s1063_s1 + $0x54] ss:$8 sps:$4 sm:$0xff]   ;;  %v760_v6 = vld [vmem:[%s1063_s1 + $0x50] ss:$8 sps:$4 sm:$0xff]  }
   0x3   :  { %322 = vmatpush1.bf16.msra.mxu0 %v754_v1  ;;  %v761_v7 = vld [vmem:[%s1063_s1 + $0x44] ss:$8 sps:$4 sm:$0xff]   ;;  %v773_v8 = vld [vmem:[%s1063_s1 + $0x174] ss:$8 sps:$4 sm:$0xff]   ;;  %v775_v9 = vld [vmem:[%s1063_s1 + $0x170] ss:$8 sps:$4 sm:$0xff]  }
   0x4   :  { %323 = vmatprep.subr.bf16.mxu0 %v755_v3  ;;  %v763_v10 = vld [vmem:[%s1063_s1 + $0x40] ss:$8 sps:$4 sm:$0xff]   ;;  %v764_v11 = vld [vmem:[%s1063_s1 + $0x34] ss:$8 sps:$4 sm:$0xff]   ;;  %364 = vmatprep.subr.bf16.mxu1 %v773_v8  ;;  %v779_v12 = vld [vmem:[%s1063_s1 + $0x164] ss:$8 sps:$4 sm:$0xff]  }
   0x5   :  { %365 = vmatpush1.bf16.msra.mxu1 %v775_v9  ;;  %v781_v13 = vld [vmem:[%s1063_s1 + $0x160] ss:$8 sps:$4 sm:$0xff]   ;;  %v766_v14 = vld [vmem:[%s1063_s1 + $0x30] ss:$8 sps:$4 sm:$0xff]   ;;  %v785_v15 = vld [vmem:[%s1063_s1 + $0x154] ss:$8 sps:$4 sm:$0xff]  }
   0x6   :  { %366 = vmatprep.subr.bf16.mxu1 %v779_v12  ;;  %v767_v16 = vld [vmem:[%s1063_s1 + $0x24] ss:$8 sps:$4 sm:$0xff]   ;;  %v787_v17 = vld [vmem:[%s1063_s1 + $0x150] ss:$8 sps:$4 sm:$0xff]   ;;  %v769_v19 = vld [vmem:[%s1063_s1 + $0x20] ss:$8 sps:$4 sm:$0xff]  }
   0x7   :  { %324 = vmatpush1.bf16.msra.mxu0 %v757_v4  ;;  %v791_v18 = vld [vmem:[%s1063_s1 + $0x144] ss:$8 sps:$4 sm:$0xff]   ;;  %v770_v20 = vld [vmem:[%s1063_s1 + $0x14] ss:$8 sps:$4 sm:$0xff]   ;;  %v793_v21 = vld [vmem:[%s1063_s1 + $0x140] ss:$8 sps:$4 sm:$0xff]  }
   0x8   :  { %325 = vmatprep.subr.bf16.mxu0 %v758_v5  ;;  %v797_v22 = vld [vmem:[%s1063_s1 + $0x134] ss:$8 sps:$4 sm:$0xff]   ;;  %v772_v23 = vld [vmem:[%s1063_s1 + $0x10] ss:$8 sps:$4 sm:$0xff]   ;;  %v776_v24 = vld [vmem:[%s1063_s1 + $0x4] ss:$8 sps:$4 sm:$0xff]  }
   0x9   :  { %367 = vmatpush1.bf16.msra.mxu1 %v781_v13  ;;  %v799_v25 = vld [vmem:[%s1063_s1 + $0x130] ss:$8 sps:$4 sm:$0xff]   ;;  %v803_v26 = vld [vmem:[%s1063_s1 + $0x124] ss:$8 sps:$4 sm:$0xff]   ;;  %v778_v27 = vld [vmem:[%s1063_s1] ss:$8 sps:$4 sm:$0xff]  }
   0xa   :  { %368 = vmatprep.subr.bf16.mxu1 %v785_v15  ;;  %v782_v28 = vld [vmem:[%s1063_s1 + $0xf4] ss:$8 sps:$4 sm:$0xff]   ;;  %v805_v29 = vld [vmem:[%s1063_s1 + $0x120] ss:$8 sps:$4 sm:$0xff]   ;;  %v784_v31 = vld [vmem:[%s1063_s1 + $0xf0] ss:$8 sps:$4 sm:$0xff]  }
   0xb   :  { %326 = vmatpush1.bf16.msra.mxu0 %v760_v6  ;;  %v809_v30 = vld [vmem:[%s1063_s1 + $0x114] ss:$8 sps:$4 sm:$0xff]   ;;  %v788_v32 = vld [vmem:[%s1063_s1 + $0xe4] ss:$8 sps:$4 sm:$0xff]   ;;  %v811_v33 = vld [vmem:[%s1063_s1 + $0x110] ss:$8 sps:$4 sm:$0xff]  }
   0xc   :  { %327 = vmatprep.subr.bf16.mxu0 %v761_v7  ;;  %v815_v34 = vld [vmem:[%s1063_s1 + $0x104] ss:$8 sps:$4 sm:$0xff]  }
   0xd   :  { %369 = vmatpush1.bf16.msra.mxu1 %v787_v17  ;;  %v827_v35 = vld [vmem:[%s1062_s0 + $0x4] ss:$12 sps:$4 sm:$0xff]  }
   0xe   :  { %370 = vmatprep.subr.bf16.mxu1 %v791_v18 }
   0xf   :  { %328 = vmatpush1.bf16.msra.mxu0 %v763_v10 }
  0x10   :  { %329 = vmatprep.subr.bf16.mxu0 %v764_v11 }
  0x11   :  { %371 = vmatpush1.bf16.msra.mxu1 %v793_v21 }
  0x12   :  { %372 = vmatprep.subr.bf16.mxu1 %v797_v22 }
  0x13   :  { %330 = vmatpush1.bf16.msra.mxu0 %v766_v14 }
  0x14   :  { %331 = vmatprep.subr.bf16.mxu0 %v767_v16 }
  0x15   :  { %373 = vmatpush1.bf16.msra.mxu1 %v799_v25 }
  0x16   :  { %374 = vmatprep.subr.bf16.mxu1 %v803_v26 }
  0x17   :  { %332 = vmatpush1.bf16.msra.mxu0 %v769_v19 }
  0x18   :  { %333 = vmatprep.subr.bf16.mxu0 %v770_v20 }
  0x19   :  { %375 = vmatpush1.bf16.msra.mxu1 %v805_v29 }
  0x1a   :  { %376 = vmatprep.subr.bf16.mxu1 %v809_v30 }
  0x1b   :  { %334 = vmatpush1.bf16.msra.mxu0 %v772_v23 }
  0x1c   :  { %335 = vmatprep.subr.bf16.mxu0 %v776_v24 }
  0x1f   :  { %336 = vmatpush1.bf16.msra.mxu0 %v778_v27 }
  0x20   :  { %337 = vmatprep.subr.bf16.mxu0 %v782_v28 }
  0x21   :  { %7 = vsyncpa [#allocation3], 0  ;;  %v790_v36 = vld [vmem:[%s1063_s1 + $0xe0] ss:$8 sps:$4 sm:$0xff]   ;;  %v794_v37 = vld [vmem:[%s1063_s1 + $0xd4] ss:$8 sps:$4 sm:$0xff]   ;;  %353 = vmatprep.mubr.bf16.mxu0 %v827_v35  ;;  %377 = vmatpush1.bf16.msra.mxu1 %v811_v33  ;;  %v512_v10 = vlaneseq }
  0x22   :  { %v817_v38 = vld [vmem:[%s1063_s1 + $0x100] ss:$8 sps:$4 sm:$0xff]   ;;  %378 = vmatprep.subr.bf16.mxu1 %v815_v34  ;;  %v796_v39 = vld [vmem:[%s1063_s1 + $0xd0] ss:$8 sps:$4 sm:$0xff]   ;;  %v800_v40 = vld [vmem:[%s1063_s1 + $0xc4] ss:$8 sps:$4 sm:$0xff]  }
  0x23   :  { %338 = vmatpush2.bf16.msra.mxu0 %v784_v31  ;;  %v821_v41 = vld [vmem:[%s1062_s0 + $0x8] ss:$12 sps:$4 sm:$0xff]   ;;  %v808_v44 = vld [vmem:[%s1063_s1 + $0xb0] ss:$8 sps:$4 sm:$0xff]   ;;  %v812_v45 = vld [vmem:[%s1063_s1 + $0xa4] ss:$8 sps:$4 sm:$0xff]  }
  0x24   :  { %339 = vmatprep.subr.bf16.mxu0 %v788_v32  ;;  %v802_v42 = vld [vmem:[%s1063_s1 + $0xc0] ss:$8 sps:$4 sm:$0xff]   ;;  %v806_v43 = vld [vmem:[%s1063_s1 + $0xb4] ss:$8 sps:$4 sm:$0xff]   ;;  %v820_v48 = vld [vmem:[%s1063_s1 + $0x90] ss:$8 sps:$4 sm:$0xff]  }
  0x25   :  { %379 = vmatpush1.bf16.msra.mxu1 %v817_v38  ;;  %v814_v46 = vld [vmem:[%s1063_s1 + $0xa0] ss:$8 sps:$4 sm:$0xff]   ;;  %v818_v47 = vld [vmem:[%s1063_s1 + $0x94] ss:$8 sps:$4 sm:$0xff]   ;;  %v822_v49 = vld [vmem:[%s1063_s1 + $0x84] ss:$8 sps:$4 sm:$0xff]  }
  0x26   :  { %v824_v50 = vld [vmem:[%s1063_s1 + $0x80] ss:$8 sps:$4 sm:$0xff]   ;;  %v859_v52 = vmov 0.0   ;;  %vm860_vm0 = vmmov 0   ;;  %vm416_vm1 = vcmask 523264   ;;  %vm547_vm2 = vcmask 1043456  }
  0x27   :  { %340 = vmatpush2.bf16.msra.mxu0 %v790_v36  ;;  %v825_v51 = vld [vmem:[%s1062_s0] ss:$12 sps:$4 sm:$0xff]   ;;  %723 = vmatprep.subr.bf16.mxu1 %v859_v52  ;;  %s861_s0 = smov 64   ;;  %v513_v11 = vshrl.u32 %v512_v10, 7  ;;  %v515_v12 = vand.u32 127, %v512_v10  ;;  %vm519_vm4 = vcmask 64512  }
  0x28   :  { %341 = vmatprep.subr.bf16.mxu0 %v794_v37  ;;  %397 = vmatmul.mubr.bf16.vlgmr.msra.gmra.mxu1 %v821_v41  ;;  %s862_s1 = smov [#allocation2]  }
  0x29   :  { %725 = vmatprep.mubr.msk.bf16.mxu1 %vm860_vm0, %v859_v52  ;;  %vm516_vm3 = vcmp.le.s32.totalorder %v515_v12, %v513_v11  ;;  %s652_s27 = sshll.u32 %s862_s1, 4  ;;  %s653_s27 = int_to_ptr.vmem [resolvable:$true] %s652_s27 }
  0x2a   :  { %s836_s28 = scalar_lea.vmem %s653_s27, 64  ;;  %p841_p1 = scmp.lt.s32.totalorder %s653_s27, %s653_s27 }
  0x2b   :  { %342 = vmatpush2.bf16.msra.mxu0 %v796_v39  ;;  %p837_p0 = scmp.ne.s32.totalorder %s653_s27, %s836_s28  ;;  %p842_p2 = scmp.lt.s32.totalorder %s836_s28, %s836_s28 }
  0x2c   :  { %343 = vmatprep.subr.bf16.mxu0 %v800_v40 }
  0x2d   :  { %p843_p3 = por %p842_p2, %p841_p1 }
  0x2f   :  { %344 = vmatpush2.bf16.msra.mxu0 %v802_v42  ;;  %p844_p4 = pnand %p843_p3, %p837_p0 }
  0x30   :  { %345 = vmatprep.subr.bf16.mxu0 %v806_v43 }
  0x33   :  { %346 = vmatpush2.bf16.msra.mxu0 %v808_v44 }
  0x34   :  { %347 = vmatprep.subr.bf16.mxu0 %v812_v45 }
  0x37   :  { %348 = vmatpush2.bf16.msra.mxu0 %v814_v46 }
  0x38   :  { %349 = vmatprep.subr.bf16.mxu0 %v818_v47 }
  0x3b   :  { %350 = vmatpush2.bf16.msra.mxu0 %v820_v48 }
  0x3c   :  { %351 = vmatprep.subr.bf16.mxu0 %v822_v49 }
  0x3f   :  { %352 = vmatpush2.bf16.msra.mxu0 %v824_v50 }
  0x42   :  { %354 = vmatmul.mubr.bf16.vlgmr.msra.gmra.mxu0 %v825_v51 }
  0xe8   :  { %v398_v53 = vpop.f32.mrf.mxu1 }
  0xea   :  { %v400_v54 = vpop.f32.mrf.mxu1 }
  0xec   :  { %v402_v60 = vpop.f32.mrf.mxu1 }
  0xee   :  { %v404_v13 = vpop.f32.mrf.mxu1 }
 0x102   :  { %v355_v55 = vpop.f32.mrf.mxu0 }
 0x103   :  { %v399_v56 = vadd.f32 %v398_v53, %v355_v55 }
 0x104   :  { %v357_v57 = vpop.f32.mrf.mxu0 }
 0x105   :  { %v401_v58 = vadd.f32 %v400_v54, %v357_v57  ;;  %v411_v59 = vpack.c.bf16 %v399_v56, %v399_v56  ;;  %v407_v2 = vmul.f32 0.125, %v399_v56 }
 0x106   :  { %v359_v61 = vpop.f32.mrf.mxu0 }
 0x107   :  { %v403_v62 = vadd.f32 %v402_v60, %v359_v61  ;;  %414 = vrot.lane.b32.xlu0 %v411_v59, %s861_s0  ;;  %v409_v4 = vpack.c.bf16 %v407_v2, %v407_v2  ;;  %v542_v7 = vpack.c.bf16 %v401_v58, %v401_v58 }
 0x108   :  { %v361_v31 = vpop.f32.mrf.mxu0 }
 0x109   :  { %v412_v63 = vpack.c.bf16 %v403_v62, %v403_v62  ;;  %v408_v6 = vmul.f32 0.125, %v403_v62  ;;  %v549_v9 = vsel %vm547_vm2, %v542_v7, 0  ;;  %v405_v33 = vadd.f32 %v404_v13, %v361_v31 }
 0x10b   :  { %464 = vrot.lane.b32.xlu0 %v412_v63, %s861_s0  ;;  %v410_v8 = vpack.c.bf16 %v408_v6, %v408_v6  ;;  %v543_v34 = vpack.c.bf16 %v405_v33, %v405_v33 }
 0x10d   :  { %v595_v38 = vsel %vm547_vm2, %v543_v34, 0 }
 0x179   :  { %v415_v0 = vpop.permute.xlu0 %414 }
 0x17a   :  { %v421_v1 = vsel %vm416_vm1, %v415_v0, 0 }
 0x17b   :  { %724 = vmatpush3.bf16.xpose.msra.mxu1 %v421_v1 }
 0x17c   :  { %729 = vmatprep.subr.bf16.mxu1 %v859_v52 }
 0x17d   :  { %v465_v3 = vpop.permute.xlu0 %464 }
 0x17e   :  { %v470_v5 = vsel %vm416_vm1, %v465_v3, 0 }
 0x182   :  { %726 = vmatmul.mubr.msk.bf16.vlgmr.msra.gmra.mxu1 %vm416_vm1, %v409_v4 }
 0x183   :  { %730 = vmatpush3.bf16.xpose.msra.mxu1 %v470_v5  ;;  %731 = vmatprep.mubr.msk.bf16.mxu1 %vm860_vm0, %v859_v52 }
 0x184   :  { %735 = vmatprep.subr.bf16.mxu1 %v859_v52 }
 0x18a   :  { %732 = vmatmul.mubr.msk.bf16.vlgmr.msra.gmra.mxu1 %vm416_vm1, %v410_v8 }
 0x18b   :  { %736 = vmatpush3.bf16.msra.mxu1 %v549_v9  ;;  %737 = vmatprep.mubr.msk.bf16.mxu1 %vm860_vm0, %v859_v52 }
 0x18c   :  { %741 = vmatprep.subr.bf16.mxu1 %v859_v52 }
 0x242   :  { %v457_v14 = vpop.f32.mrf.mxu1 }
 0x243   :  { %v517_v15 = vsel %vm516_vm3, %v457_v14, -1e+30 }
 0x244   :  { %v727_v16 = vpop.f32.mrf.mxu1  ;;  %v520_v17 = vsel %vm519_vm4, %v517_v15, -inf }
 0x245   :  { %521 = vmax.xlane.f32.xlu1 %v520_v17 }
 0x246   :  { %v460_v18 = vpop.f32.mrf.mxu1 }
 0x248   :  { %v728_v19 = vpop.f32.mrf.mxu1 }
 0x24a   :  { %v506_v20 = vpop.f32.mrf.mxu1 }
 0x24b   :  { %v518_v21 = vsel %vm516_vm3, %v506_v20, -1e+30 }
 0x24c   :  { %v733_v22 = vpop.f32.mrf.mxu1  ;;  %v523_v23 = vsel %vm519_vm4, %v518_v21, -inf }
 0x24d   :  { %524 = vmax.xlane.f32.xlu1 %v523_v23 }
 0x24e   :  { %v509_v24 = vpop.f32.mrf.mxu1 }
 0x250   :  { %v734_v25 = vpop.f32.mrf.mxu1 }
 0x2ce   :  { %v522_v26 = vpop.xlane.xlu1 %521 }
 0x2cf   :  { %v526_v27 = vsub.f32 %v517_v15, %v522_v26 }
 0x2d1   :  { %v528_v28 = vmul.f32 1.442695, %v526_v27 }
 0x2d3   :  { %828 = vpow2.f32 %v528_v28 }
 0x2d6   :  { %v525_v29 = vpop.xlane.xlu1 %524 }
 0x2d7   :  { %v527_v30 = vsub.f32 %v518_v21, %v525_v29 }
 0x2d9   :  { %v530_v32 = vmul.f32 1.442695, %v527_v30 }
 0x2db   :  { %830 = vpow2.f32 %v530_v32 }
 0x2e0   :  { %v829_v35 = vpop.eup %828 }
 0x2e1   :  { %v532_v36 = vsel %vm519_vm4, %v829_v35, 0.0  ;;  %v540_v37 = vpack.c.bf16 %v829_v35, %v829_v35 }
 0x2e2   :  { %533 = vadd.xlane.f32.xlu1 %v532_v36 }
 0x2e3   :  { %738 = vmatmul.mubr.msk.bf16.vlgmr.msra.gmra.mxu1 %vm519_vm4, %v540_v37 }
 0x2e4   :  { %742 = vmatpush3.bf16.msra.mxu1 %v595_v38  ;;  %743 = vmatprep.mubr.msk.bf16.mxu1 %vm860_vm0, %v859_v52 }
 0x2e8   :  { %v831_v39 = vpop.eup %830 }
 0x2e9   :  { %v535_v40 = vsel %vm519_vm4, %v831_v39, 0.0  ;;  %v541_v41 = vpack.c.bf16 %v831_v39, %v831_v39 }
 0x2ea   :  { %536 = vadd.xlane.f32.xlu0 %v535_v40 }
 0x2eb   :  { %744 = vmatmul.mubr.msk.bf16.vlgmr.msra.gmra.mxu1 %vm519_vm4, %v541_v41 }
 0x36b   :  { %v534_v53 = vpop.xlane.xlu1 %533 }
 0x373   :  { %v537_v42 = vpop.xlane.xlu0 %536 }
 0x374   :  { %832 = vrcp.f32 %v537_v42 }
 0x375   :  { %834 = vrcp.f32 %v534_v53 }
 0x381   :  { %v833_v47 = vpop.eup %832 }
 0x382   :  { %v835_v54 = vpop.eup %834 }
 0x3a3   :  { %v585_v43 = vpop.f32.mrf.mxu1 }
 0x3a4   :  { %v637_v55 = vmul.f32 %v835_v54, %v585_v43 }
 0x3a5   :  { %v739_v44 = vpop.f32.mrf.mxu1 }
 0x3a7   :  { %v588_v45 = vpop.f32.mrf.mxu1 }
 0x3a9   :  { %v740_v46 = vpop.f32.mrf.mxu1 }
 0x3ab   :  { %v631_v48 = vpop.f32.mrf.mxu1 }
 0x3ac   :  { %v638_v49 = vmul.f32 %v833_v47, %v631_v48 }
 0x3ad   :  { %v745_v50 = vpop.f32.mrf.mxu1 }
 0x3ae   :  { %640 = vrot.lane.b32.xlu1 %v638_v49, %s861_s0 }
 0x3af   :  { %v634_v51 = vpop.f32.mrf.mxu1 }
 0x3b1   :  { %v746_v52 = vpop.f32.mrf.mxu1 }
 0x420   :  { %v641_v56 = vpop.permute.xlu1 %640 }
 0x421   :  { %v643_v57 = vsel %vm416_vm1, %v637_v55, %v641_v56 }
 0x422   :  { %v644_v58 = vpack.c.bf16 %v643_v57, %v643_v57 }
 0x424   :  { %645 = vst [vmem:[#allocation2] sm:$0xf] %v644_v58 }
 0x425   :  { %847 = shalt.err (!%p844_p4)
}
 0x426   :  { %655 = dma.vmem_to_hbm [thread:$0]  %s653_s27, 64, %s1064_s2, [#allocation3]  }
 0x427   :  { %856 = dma.done.wait [#allocation3], 64  }
 0x428   :  { %857 = vsyncadd [#allocation3], 4294967232 }
 0x429   :  { %659 = vsyncpa [#allocation3], 1 }

</bundles_post_ra>
